<compile_context>
chip_gen: v7x
topology: tpu7x:2x2x1
jax: 0.10.0
libtpu: 0.0.40
codegen_flags: <defaults>
</compile_context>

<pallas_src>
import jax
import jax.numpy as jnp
from jax import lax
from jax.experimental import pallas as pl
from jax.experimental.pallas import tpu as pltpu


def encoder_first_pose_kernel(x_ref, w1_ref, w2_ref, b_ref, o_ref):
    x = x_ref[...]                        # (TB, D)
    w1 = w1_ref[...]                      # (H, D)  -- PyTorch layout
    w2 = w2_ref[...]                      # (H, H)
    b1 = b_ref[0:1, :]                    # (1, H) lane-aligned broadcast
    b2 = b_ref[1:2, :]                    # (1, H)

    # x @ W1^T on the MXU (contract x dim 1 with w1 dim 1 — no transpose op).
    h1 = lax.dot_general(
        x, w1,
        dimension_numbers=(((1,), (1,)), ((), ())),
        preferred_element_type=jnp.float32,
    )
    h1 = jnp.tanh(h1 + b1)

    # h1 @ W2^T on the MXU.
    h2 = lax.dot_general(
        h1, w2,
        dimension_numbers=(((1,), (1,)), ((), ())),
        preferred_element_type=jnp.float32,
    )
    h2 = jnp.tanh(h2 + b2)

    o_ref[...] = h2.astype(o_ref.dtype)


def encoder_first_pose(x, w1, b1, w2, b2, *, tb_max=512):
    """x: (B, D_in); w1: (H, D_in); b1: (H,); w2: (H, H); b2: (H,)
    (PyTorch nn.Linear weight convention). Returns (B, H)."""
    B, D = x.shape
    H = w1.shape[0]

    # Pack both biases into one operand (single DMA descriptor).
    # Under jit with constant params this stack constant-folds.
    b_packed = jnp.stack([b1, b2], axis=0)          # (2, H)

    # Batch tiling: one tile for small B, fixed-size tiles (8-row aligned)
    # with zero padding for large B so the pipeline can double-buffer.
    if B <= tb_max:
        TB = B
        B_pad = B
        x_p = x
    else:
        TB = tb_max
        B_pad = ((B + TB - 1) // TB) * TB
        x_p = jnp.pad(x, ((0, B_pad - B), (0, 0))) if B_pad != B else x

    grid = (B_pad // TB,)

    out = pl.pallas_call(
        encoder_first_pose_kernel,
        out_shape=jax.ShapeDtypeStruct((B_pad, H), x.dtype),
        grid=grid,
        in_specs=[
            pl.BlockSpec((TB, D), lambda i: (i, 0)),   # x: batch-tiled
            pl.BlockSpec((H, D), lambda i: (0, 0)),    # w1: VMEM-resident
            pl.BlockSpec((H, H), lambda i: (0, 0)),    # w2: VMEM-resident
            pl.BlockSpec((2, H), lambda i: (0, 0)),    # packed biases
        ],
        out_specs=pl.BlockSpec((TB, H), lambda i: (i, 0)),
        compiler_params=pltpu.CompilerParams(
            dimension_semantics=("parallel",),
        ),
    )(x_p, w1, w2, b_packed)

    return out if B_pad == B else out[:B]


def reference(x, w1, b1, w2, b2):
    h1 = jnp.tanh(x @ w1.T + b1)
    h2 = jnp.tanh(h1 @ w2.T + b2)
    return h2


if __name__ == "__main__":
    # Small shapes consistent with the module: input_size=16, hidden_size=32.
    batch = 8
    input_size = 16
    hidden_size = 32

    key = jax.random.PRNGKey(0)
    kx, k1, k2, k3, k4 = jax.random.split(key, 5)

    x = jax.random.normal(kx, (batch, input_size), dtype=jnp.float32)

    # Deterministic parameter init (PyTorch nn.Linear shape convention).
    bound1 = 1.0 / (input_size ** 0.5)
    w1 = jax.random.uniform(k1, (hidden_size, input_size),
                            minval=-bound1, maxval=bound1, dtype=jnp.float32)
    b1 = jax.random.uniform(k2, (hidden_size,),
                            minval=-bound1, maxval=bound1, dtype=jnp.float32)
    bound2 = 1.0 / (hidden_size ** 0.5)
    w2 = jax.random.uniform(k3, (hidden_size, hidden_size),
                            minval=-bound2, maxval=bound2, dtype=jnp.float32)
    b2 = jax.random.uniform(k4, (hidden_size,),
                            minval=-bound2, maxval=bound2, dtype=jnp.float32)

    out = encoder_first_pose(x, w1, b1, w2, b2)
    out = jax.block_until_ready(out)

    ref = reference(x, w1, b1, w2, b2)
    assert out.shape == (batch, hidden_size)
    assert jnp.allclose(out, ref, atol=1e-5, rtol=1e-5), "mismatch vs reference"

    print("KERNEL_OK")
</pallas_src>

<mosaic_0001>
module attributes {stable_mosaic.version = 11 : i64} {
  func.func @encoder_first_pose_kernel(%arg0: i32, %arg1: memref<8x16xf32, #tpu.memory_space<vmem>>, %arg2: memref<32x16xf32, #tpu.memory_space<vmem>>, %arg3: memref<32x32xf32, #tpu.memory_space<vmem>>, %arg4: memref<2x32xf32, #tpu.memory_space<vmem>>, %arg5: memref<8x32xf32, #tpu.memory_space<vmem>>) attributes {dimension_semantics = [#tpu.dimension_semantics<parallel>], iteration_bounds = array<i64: 1>, scalar_prefetch = 0 : i64, scratch_operands = 0 : i64, tpu.core_type = #tpu.core_type<tc>, window_params = [{transform_indices = @transform_0, window_bounds = array<i64: 8, 16>}, {pipeline_mode = #tpu.pipeline_mode<synchronous>, transform_indices = @transform_1, window_bounds = array<i64: 32, 16>}, {pipeline_mode = #tpu.pipeline_mode<synchronous>, transform_indices = @transform_2, window_bounds = array<i64: 32, 32>}, {pipeline_mode = #tpu.pipeline_mode<synchronous>, transform_indices = @transform_3, window_bounds = array<i64: 2, 32>}, {transform_indices = @transform_4, window_bounds = array<i64: 8, 32>}]} {
    %c0 = arith.constant 0 : index
    %c0_0 = arith.constant 0 : index
    %0 = vector.load %arg1[%c0, %c0_0] : memref<8x16xf32, #tpu.memory_space<vmem>>, vector<8x16xf32>
    %c0_1 = arith.constant 0 : index
    %c0_2 = arith.constant 0 : index
    %1 = vector.load %arg2[%c0_1, %c0_2] : memref<32x16xf32, #tpu.memory_space<vmem>>, vector<32x16xf32>
    %c0_3 = arith.constant 0 : index
    %c0_4 = arith.constant 0 : index
    %2 = vector.load %arg3[%c0_3, %c0_4] : memref<32x32xf32, #tpu.memory_space<vmem>>, vector<32x32xf32>
    %c0_5 = arith.constant 0 : index
    %c0_6 = arith.constant 0 : index
    %3 = vector.load %arg4[%c0_5, %c0_6] : memref<2x32xf32, #tpu.memory_space<vmem>>, vector<1x32xf32>
    %c1 = arith.constant 1 : index
    %c0_7 = arith.constant 0 : index
    %4 = vector.load %arg4[%c1, %c0_7] : memref<2x32xf32, #tpu.memory_space<vmem>>, vector<1x32xf32>
    %cst = arith.constant dense<0.000000e+00> : vector<8x32xf32>
    %5 = tpu.matmul %0, %1, %cst {dimension_numbers = #tpu.dot_dimension_numbers<[1], [1], [0], [0], [0, 0, 1, 0], [], []>} : vector<8x16xf32>, vector<32x16xf32>, vector<8x32xf32> -> vector<8x32xf32>
    %6 = vector.broadcast %3 : vector<1x32xf32> to vector<8x32xf32>
    %7 = arith.addf %5, %6 : vector<8x32xf32>
    %8 = math.tanh %7 : vector<8x32xf32>
    %cst_8 = arith.constant dense<0.000000e+00> : vector<8x32xf32>
    %9 = tpu.matmul %8, %2, %cst_8 {dimension_numbers = #tpu.dot_dimension_numbers<[1], [1], [0], [0], [0, 0, 1, 0], [], []>} : vector<8x32xf32>, vector<32x32xf32>, vector<8x32xf32> -> vector<8x32xf32>
    %10 = vector.broadcast %4 : vector<1x32xf32> to vector<8x32xf32>
    %11 = arith.addf %9, %10 : vector<8x32xf32>
    %12 = math.tanh %11 : vector<8x32xf32>
    %c0_9 = arith.constant 0 : index
    %c0_10 = arith.constant 0 : index
    %13 = vector.load %arg5[%c0_9, %c0_10] : memref<8x32xf32, #tpu.memory_space<vmem>>, vector<8x32xf32>
    tpu.vector_store %arg5[%c0_9, %c0_10], %12 {strides = array<i32>} : memref<8x32xf32, #tpu.memory_space<vmem>>, vector<8x32xf32>,
    return
  }
  func.func @transform_0(%arg0: i32) -> (i32, i32) {
    %c0_i32 = arith.constant 0 : i32
    %c0_i32_0 = arith.constant 0 : i32
    return %arg0, %c0_i32 : i32, i32
  }
  func.func @transform_1(%arg0: i32) -> (i32, i32) {
    %c0_i32 = arith.constant 0 : i32
    %c0_i32_0 = arith.constant 0 : i32
    %c0_i32_1 = arith.constant 0 : i32
    return %c0_i32, %c0_i32_0 : i32, i32
  }
  func.func @transform_2(%arg0: i32) -> (i32, i32) {
    %c0_i32 = arith.constant 0 : i32
    %c0_i32_0 = arith.constant 0 : i32
    %c0_i32_1 = arith.constant 0 : i32
    return %c0_i32, %c0_i32_0 : i32, i32
  }
  func.func @transform_3(%arg0: i32) -> (i32, i32) {
    %c0_i32 = arith.constant 0 : i32
    %c0_i32_0 = arith.constant 0 : i32
    %c0_i32_1 = arith.constant 0 : i32
    return %c0_i32, %c0_i32_0 : i32, i32
  }
  func.func @transform_4(%arg0: i32) -> (i32, i32) {
    %c0_i32 = arith.constant 0 : i32
    %c0_i32_0 = arith.constant 0 : i32
    return %arg0, %c0_i32 : i32, i32
  }
}

</mosaic_0001>

<bundles_post_ra>
// kernel: tpu_custom_call.1
= control target key start
LH: loop header
LB: loop body
LE: loop exit
PB: predicated region body
PF: predicated region fallthrough
CT: control target
= control target key end

     0   :  { %vm33_vm0 = vcmask 130048   ;;  %v318_v2 = vmov 0.0|0.0   ;;  %vm124_vm2 = vcmask 261120   ;;  %vm319_vm3 = vmmov 0   ;;  %s415_s0 = inlined_call_operand.vmem [shape: f32[8,16], index: 0, kind: input, shape index: {}]   ;;  %s416_s1 = inlined_call_operand.vmem [shape: f32[32,16], index: 1, kind: input, shape index: {}]   ;;  %s417_s2 = inlined_call_operand.vmem [shape: f32[32,32], index: 2, kind: input, shape index: {}]   ;;  %s418_s3 = inlined_call_operand.vmem [shape: f32[2,32], index: 3, kind: input, shape index: {}]   ;;  %s419_s4 = inlined_call_operand.hbm [shape: f32[8,32], index: 4, kind: output, shape index: {}]  }
   0x1   :  { %v19_v0 = vld [vmem:[%s416_s1] sm:$0xff]  ;;  %v20_v1 = vld [vmem:[%s416_s1 + $0x8] sm:$0xff]  ;;  %270 = vmatprep.subr.bf16.mxu0 %v318_v2  ;;  %vm355_vm1 = vmpackc.low %vm33_vm0, %vm33_vm0  ;;  %278 = vmatprep.subr.bf16.mxu1 %v318_v2  ;;  %v320_v5 = vmov 0.0  }
   0x2   :  { %v271_v3 = vpack.c.bf16 %v20_v1, %v19_v0  ;;  %256 = vmatprep.mubr.msk.f32.mxu0 %vm319_vm3, %v320_v5  ;;  %v23_v6 = vld [vmem:[%s417_s2] sm:$0xff]  ;;  %v24_v7 = vld [vmem:[%s417_s2 + $0x8] sm:$0xff]  ;;  %vm367_vm4 = vmpackc.low %vm124_vm2, %vm124_vm2  ;;  %267 = vmatprep.mubr.msk.f32.mxu1 %vm319_vm3, %v320_v5 }
   0x3   :  { %v279_v9 = vpack.c.bf16 %v24_v7, %v23_v6 }
   0x4   :  { %273 = vmatpush3.bf16.xpose.msk.msra.mxu0 %vm355_vm1, %v271_v3 }
   0x5   :  { %9 = vsyncpa [#allocation3], 0  ;;  %274 = vmatprep.subr.bf16.mxu0 %v318_v2  ;;  %v21_v10 = vld [vmem:[%s416_s1 + $0x10] sm:$0xff]  ;;  %v22_v11 = vld [vmem:[%s416_s1 + $0x18] sm:$0xff]  ;;  %281 = vmatpush3.bf16.xpose.msk.msra.mxu1 %vm367_vm4, %v279_v9 }
   0x6   :  { %282 = vmatprep.subr.bf16.mxu1 %v318_v2  ;;  %v275_v12 = vpack.c.bf16 %v22_v11, %v21_v10  ;;  %v18_v13 = vld [vmem:[%s415_s0] sm:$0xff]  ;;  %v25_v14 = vld [vmem:[%s417_s2 + $0x10] sm:$0xff]  ;;  %v26_v15 = vld [vmem:[%s417_s2 + $0x18] sm:$0xff]  ;;  %s321_s2 = smov [#allocation2]  }
   0x7   :  { %v283_v16 = vpack.c.bf16 %v26_v15, %v25_v14  ;;  %v226_v17 = vld [vmem:[%s418_s3] ss:$0 sm:$0xff]  ;;  %v232_v22 = vld [vmem:[%s418_s3 + $0x1] ss:$0 sm:$0xff]  ;;  %s218_s9 = sshll.u32 %s321_s2, 4  ;;  %s219_s9 = int_to_ptr.vmem [resolvable:$true] %s218_s9 }
   0x8   :  { %s294_s10 = scalar_lea.vmem %s219_s9, 128  ;;  %p299_p1 = scmp.lt.s32.totalorder %s219_s9, %s219_s9 }
   0x9   :  { %p295_p0 = scmp.ne.s32.totalorder %s219_s9, %s294_s10  ;;  %p300_p2 = scmp.lt.s32.totalorder %s294_s10, %s294_s10 }
   0xb   :  { %p301_p3 = por %p300_p2, %p299_p1 }
   0xc   :  { %277 = vmatpush3.bf16.xpose.msk.msra.mxu0 %vm355_vm1, %v275_v12 }
   0xd   :  { %285 = vmatpush3.bf16.xpose.msk.msra.mxu1 %vm367_vm4, %v283_v16  ;;  %p302_p4 = pnand %p301_p3, %p295_p0 }
  0x13   :  { %257 = vmatmul.mubr.msk.f32.vlgmr.msra.gmra.mrb[0].mxu0 %vm33_vm0, %v18_v13 }
  0xe6   :  { %v115_v18 = vpop.f32.mrb[0].mxu0 }
  0xe7   :  { %v116_v19 = vadd.f32 %v226_v17, %v115_v18  ;;  %v258_v20 = vpop.f32.mrb[1].mxu0 }
  0xe9   :  { %290 = vtanh.f32 %v116_v19 }
  0xf3   :  { %v291_v21 = vpop.eup %290 }
  0xf4   :  { %268 = vmatmul.mubr.msk.f32.vlgmr.msra.gmra.mrb[0].mxu1 %vm124_vm2, %v291_v21 }
 0x1c7   :  { %v206_v23 = vpop.f32.mrb[0].mxu1 }
 0x1c8   :  { %v207_v24 = vadd.f32 %v232_v22, %v206_v23  ;;  %v269_v25 = vpop.f32.mrb[1].mxu1 }
 0x1ca   :  { %292 = vtanh.f32 %v207_v24 }
 0x1d4   :  { %v293_v26 = vpop.eup %292 }
 0x1d5   :  { %211 = vst.msk [vmem:[#allocation2] sm:$0xff] %vm124_vm2, %v293_v26 }
 0x1d6   :  { %305 = shalt.err (!%p302_p4)
}
 0x1d7   :  { %s306_s3 = scalar_lea.hbm %s419_s4, 128 }
 0x1d8   :  { %p307_p5 = scmp.ne.s32.totalorder %s419_s4, %s306_s3  ;;  %p310_p6 = scmp.lt.u32.totalorder %s306_s3, %s419_s4 }
 0x1da   :  { %p312_p7 = pnand %p310_p6, %p307_p5 }
 0x1dc   :  { %315 = shalt.err (!%p312_p7)
}
 0x1dd   :  { %221 = dma.vmem_to_hbm [thread:$0]  %s219_s9, 128, %s419_s4, [#allocation3]  }
 0x1de   :  { %316 = dma.done.wait [#allocation3], 128  }
 0x1df   :  { %317 = vsyncadd [#allocation3], 4294967168 }
 0x1e0   :  { %225 = vsyncpa [#allocation3], 1 }

</bundles_post_ra>
